<compile_context>
chip_gen: v6e
topology: v6e:2x2x1
jax: 0.10.0
libtpu: 0.0.40
codegen_flags: <defaults>
</compile_context>

<pallas_src>
import jax
import jax.numpy as jnp
from jax.experimental import pallas as pl
from jax.experimental.pallas import tpu as pltpu

LANES = 128
_MIB = 1024 * 1024


def _affine_kernel(scale_ref, bias_ref, x_ref, o_ref):
    # scale_ref / bias_ref: SMEM f32 scalars of shape (1,)
    # x_ref / o_ref: VMEM tile (tile_rows, 128)
    s = scale_ref[0]
    b = bias_ref[0]
    y = x_ref[...].astype(jnp.float32) * s + b
    o_ref[...] = y.astype(o_ref.dtype)


def _vmem_capacity_bytes():
    try:
        return int(pltpu.get_tpu_info().vmem_capacity_bytes)
    except Exception:
        return 64 * _MIB  # conservative fallback (v7x per-TC VMEM size)


def _affine_2d(x2d, scale_f32, bias_f32, *, target_block_bytes):
    rows, lanes = x2d.shape
    itemsize = jnp.dtype(x2d.dtype).itemsize
    vmem_cap = _vmem_capacity_bytes()

    # Keep a single block <= ~1/8 of physical VMEM so (in + out, double-buffered)
    # plus the f32 compute temporary fits with headroom on every generation.
    block_bytes = max(lanes * itemsize * 8, min(target_block_bytes, vmem_cap // 8))
    cap_rows = max(8, (block_bytes // (lanes * itemsize)) // 8 * 8)

    if rows < 16:
        tile_rows = rows                       # full-extent block: always legal
        grid = (1,)
    else:
        # Guarantee >= 2 grid steps so the "parallel" axis can shard across both
        # TensorCores on v7x; a partial last block is masked by Pallas.
        half_rows = ((pl.cdiv(rows, 2) + 7) // 8) * 8   # multiple of 8
        tile_rows = min(cap_rows, half_rows)
        grid = (pl.cdiv(rows, tile_rows),)

    block_bytes_actual = tile_rows * lanes * itemsize
    vmem_needed = 4 * block_bytes_actual                 # in + out, double-buffered
    if x2d.dtype != jnp.float32:
        vmem_needed += 2 * tile_rows * lanes * 4         # f32 compute temporary
    vmem_limit = int(min(vmem_cap, vmem_needed + 4 * _MIB))

    total = rows * lanes
    cost = pl.CostEstimate(
        flops=2 * total, transcendentals=0, bytes_accessed=2 * total * itemsize)

    return pl.pallas_call(
        _affine_kernel,
        out_shape=jax.ShapeDtypeStruct((rows, lanes), x2d.dtype),
        grid_spec=pltpu.PrefetchScalarGridSpec(
            num_scalar_prefetch=0,
            grid=grid,
            in_specs=[
                pl.BlockSpec(memory_space=pltpu.SMEM),            # scale (1,) f32
                pl.BlockSpec(memory_space=pltpu.SMEM),            # bias  (1,) f32
                pl.BlockSpec((tile_rows, lanes), lambda i: (i, 0)),
            ],
            out_specs=pl.BlockSpec((tile_rows, lanes), lambda i: (i, 0)),
        ),
        compiler_params=pltpu.CompilerParams(
            dimension_semantics=("parallel",),    # megacore-shardable on v7x
            vmem_limit_bytes=vmem_limit,
        ),
        cost_estimate=cost,
    )(scale_f32, bias_f32, x2d)


def learnable_affine_block(x, scale, bias, *, target_block_bytes=6 * _MIB):
    """Apply y = scale * x + bias elementwise with a Pallas TPU kernel.

    x: any-shape float array (e.g. NCHW). scale, bias: shape (1,) params.
    """
    orig_shape = x.shape
    orig_dtype = x.dtype
    scale_f32 = scale.reshape(-1).astype(jnp.float32)
    bias_f32 = bias.reshape(-1).astype(jnp.float32)

    total = x.size
    if total == 0:
        return x
    x_flat = x.reshape(-1)

    aligned = (total // LANES) * LANES
    if aligned == total:
        # Fast path: free reshape to a lane-dense (rows, 128) slab.
        out2d = _affine_2d(x_flat.reshape(-1, LANES), scale_f32, bias_f32,
                           target_block_bytes=target_block_bytes)
        return out2d.reshape(orig_shape)

    if aligned == 0:
        # Tiny tensor (< 128 elements): plain JAX beats any kernel launch.
        y = scale_f32[0] * x_flat.astype(jnp.float32) + bias_f32[0]
        return y.astype(orig_dtype).reshape(orig_shape)

    # Rare tail path: kernel on the 128-aligned prefix, <128-element tail in
    # plain JAX (avoids the pad + full-output-slice extra HBM passes).
    head = _affine_2d(x_flat[:aligned].reshape(-1, LANES), scale_f32, bias_f32,
                      target_block_bytes=target_block_bytes).reshape(-1)
    tail = (scale_f32[0] * x_flat[aligned:].astype(jnp.float32)
            + bias_f32[0]).astype(orig_dtype)
    return jnp.concatenate([head, tail]).reshape(orig_shape)


if __name__ == "__main__":
    key = jax.random.PRNGKey(0)

    # Parameters as in the module (scale_value=1.0, bias_value=0.0), perturbed
    # deterministically so the affine transform is non-trivial. Kept float32
    # like the PyTorch nn.Parameter.
    scale = jnp.array([1.5], dtype=jnp.float32)
    bias = jnp.array([-0.25], dtype=jnp.float32)

    # Example input consistent with a conv feature map: NCHW
    x = jax.random.normal(key, (2, 4, 16, 16), dtype=jnp.float32)

    y = learnable_affine_block(x, scale, bias)
    y = jax.block_until_ready(y)

    # Correctness check against plain JAX reference.
    y_ref = scale[0] * x + bias[0]
    assert y.shape == x.shape and y.dtype == x.dtype
    assert jnp.allclose(y, y_ref, atol=1e-6, rtol=1e-6)

    print("KERNEL_OK")
</pallas_src>

<mosaic_0001>
module attributes {stable_mosaic.version = 11 : i64} {
  func.func @_affine_kernel(%arg0: i32, %arg1: memref<1xf32, #tpu.memory_space<smem>>, %arg2: memref<1xf32, #tpu.memory_space<smem>>, %arg3: memref<8x128xf32, #tpu.memory_space<vmem>>, %arg4: memref<8x128xf32, #tpu.memory_space<vmem>>) attributes {dimension_semantics = [#tpu.dimension_semantics<parallel>], iteration_bounds = array<i64: 2>, scalar_prefetch = 0 : i64, scratch_operands = 0 : i64, tpu.core_type = #tpu.core_type<tc>, window_params = [{transform_indices = @transform_0, window_bounds = array<i64: 1>}, {transform_indices = @transform_1, window_bounds = array<i64: 1>}, {transform_indices = @transform_2, window_bounds = array<i64: 8, 128>}, {transform_indices = @transform_3, window_bounds = array<i64: 8, 128>}]} {
    %c0 = arith.constant 0 : index
    %0 = memref.load %arg1[%c0] : memref<1xf32, #tpu.memory_space<smem>>
    %c0_0 = arith.constant 0 : index
    %1 = memref.load %arg2[%c0_0] : memref<1xf32, #tpu.memory_space<smem>>
    %c0_1 = arith.constant 0 : index
    %c0_2 = arith.constant 0 : index
    %2 = vector.load %arg3[%c0_1, %c0_2] : memref<8x128xf32, #tpu.memory_space<vmem>>, vector<8x128xf32>
    %3 = vector.broadcast %0 : f32 to vector<8x128xf32>
    %4 = arith.mulf %2, %3 : vector<8x128xf32>
    %5 = vector.broadcast %1 : f32 to vector<8x128xf32>
    %6 = arith.addf %4, %5 : vector<8x128xf32>
    %c0_3 = arith.constant 0 : index
    %c0_4 = arith.constant 0 : index
    %7 = vector.load %arg4[%c0_3, %c0_4] : memref<8x128xf32, #tpu.memory_space<vmem>>, vector<8x128xf32>
    tpu.vector_store %arg4[%c0_3, %c0_4], %6 {strides = array<i32>} : memref<8x128xf32, #tpu.memory_space<vmem>>, vector<8x128xf32>,
    return
  }
  func.func @transform_0(%arg0: i32) -> i32 {
    %c0_i32 = arith.constant 0 : i32
    %c0_i32_0 = arith.constant 0 : i32
    return %c0_i32 : i32
  }
  func.func @transform_1(%arg0: i32) -> i32 {
    %c0_i32 = arith.constant 0 : i32
    %c0_i32_0 = arith.constant 0 : i32
    return %c0_i32 : i32
  }
  func.func @transform_2(%arg0: i32) -> (i32, i32) {
    %c0_i32 = arith.constant 0 : i32
    %c0_i32_0 = arith.constant 0 : i32
    return %arg0, %c0_i32 : i32, i32
  }
  func.func @transform_3(%arg0: i32) -> (i32, i32) {
    %c0_i32 = arith.constant 0 : i32
    %c0_i32_0 = arith.constant 0 : i32
    return %arg0, %c0_i32 : i32, i32
  }
}

</mosaic_0001>

<bundles_post_ra>
// kernel: tpu_custom_call.1
= control target key start
LH: loop header
LB: loop body
LE: loop exit
PB: predicated region body
PF: predicated region fallthrough
CT: control target
= control target key end

     0   :  { %s601_s0 = inlined_call_operand.<no memory space> [shape: f32[1], index: 0, kind: input, shape index: {}]   ;;  %s602_s1 = inlined_call_operand.<no memory space> [shape: f32[1], index: 1, kind: input, shape index: {}]   ;;  %s603_s2 = inlined_call_operand.hbm [shape: f32[16,128], index: 2, kind: input, shape index: {}]   ;;  %s604_s3 = inlined_call_operand.hbm [shape: f32[16,128], index: 3, kind: output, shape index: {}]  }
   0x1   :  { %8 = sst [smem:[#allocation2]] %s601_s0 }
   0x2   :  { %9 = sst [smem:[#allocation3]] %s602_s1 }
   0x3   :  { %10 = vsyncpa [#allocation5], 0 }
   0x4   :  { %12 = vsyncpa [#allocation5 + $0x1], 0 }
   0x5   :  { %13 = vsyncpa [#allocation6], 0 }
   0x6   :  { %15 = vsyncpa [#allocation6 + $0x1], 0  ;;  %s460_s16 = smov 0   ;;  %s462_s17 = smov 0  }
   0x7   :  { %s464_s18 = smov 0   ;;  %s466_s19 = smov 0  }
   0x8 LB: > { %s481_s0 = sadd.s32 4294967295, %s430_s19   ;;  %s280_s1 = sadd.s32 4294967294, %s430_s19   ;;  %s430_s19 = sphi %s466_s19, %s621_s19   ;;  %s426_s18 = sphi %s464_s18, %s620_s18   ;;  %s422_s17 = sphi %s462_s17, %s619_s17   ;;  %s418_s16 = sphi %s460_s16, %s618_s16  }
   0x9   : > { %s485_s20 = sadd.s32 1, %s430_s19   ;;  %s70_s21 = sadd.s32 1, %s426_s18 }
   0xa   : > { %s67_s22 = ssub.s32 %s430_s19, %s485_s20  ;;  %p77_p0 = scmp.ne.s32.totalorder %s426_s18, %s422_s17 }
   0xb   : > { %p68_p1 = scmp.eq.s32.totalorder %s67_s22, 0  ;;  %p78_p2 = scmp.eq.s32.totalorder %s430_s19, 0 }
   0xc   : > { %p83_p3 = scmp.ne.s32.totalorder %s422_s17, %s418_s16  ;;  %p84_p4 = scmp.eq.s32.totalorder %s481_s0, 0 }
   0xd   : > { %s497_s23 = scalar_select %p68_p1, %s426_s18, %s70_s21  }
   0xe   : > { %p499_p5 = por %p78_p2, %p77_p0  ;;  %p503_p6 = por %p84_p4, %p83_p3 }
   0xf   : > { %p107_p7 = scmp.eq.s32.totalorder %s481_s0, 1  ;;  %p113_p8 = scmp.eq.s32.totalorder %s280_s1, 1 }
  0x10   : > { %s608_s25 = scalar_select %p503_p6, 1, 0 }
  0x11   : > { %p304_p10 = scmp.lt.s32.totalorder %s430_s19, 2  ;;  %p510_p11 = por %p107_p7, %p77_p0 }
  0x12   : > { %p514_p12 = por %p113_p8, %p83_p3  ;;  %s139_s28 = sand.u32 1, %s426_s18  }
  0x13   : > { %s609_s26 = scalar_select %p510_p11, 1, 0 }
  0x14   : > { %s610_s27 = scalar_select %p514_p12, 1, 0 }
  0x15   : > { %s284_s29 = sshll.u32 %s430_s19, 7  ;;  %s283_s30 = sshll.u32 %s139_s28, 3 }
  0x16   : > { %s523_s6 = scalar_lea.hbm %s603_s2, %s284_s29  ;;  %s143_s7 = scalar_lea.vmem [#allocation4], %s283_s30 }
  0x17   : > { %s150_s8 = sshll.u32 %s143_s7, 4  ;;  %p527_p13 = pnand %p304_p10, %p499_p5  ;;  %s531_s8 = int_to_ptr.vmem [resolvable:$true] %s150_s8 }
  0x18   : > { %s140_s10 = scalar_lea.sflag [#allocation5], %s139_s28  ;;  %s338_s11 = scalar_lea.hbm %s523_s6, 128 }
  0x19   : > { %p339_p2 = scmp.ne.s32.totalorder %s523_s6, %s338_s11  ;;  %p340_p3 = pneg %p527_p13 }
  0x1a   : > { %s343_s14 = scalar_lea.hbm %s603_s2, 256  ;;  %p344_p5 = scmp.lt.s32.totalorder %s523_s6, %s603_s2 }
  0x1b   : > { %p341_p4 = pnand %p340_p3, %p339_p2  ;;  %p345_p8 = scmp.lt.s32.totalorder %s343_s14, %s338_s11 }
  0x1d   : > { %p342_p7 = pneg %p341_p4  ;;  %p346_p10 = por %p345_p8, %p344_p5 }
  0x1f   : > { %p347_p9 = pnand %p346_p10, %p342_p7 }
  0x21   : > { %350 = shalt.err (!%p347_p9)
}
  0x22   : > { %s351_s21 = scalar_lea.vmem %s531_s8, 128  ;;  %s432_s22 = smov [#allocation4]  }
  0x23   : > { %p352_p0 = scmp.ne.s32.totalorder %s531_s8, %s351_s21  ;;  %s356_s24 = sshll.u32 %s432_s22, 4  ;;  %s357_s24 = int_to_ptr.vmem [resolvable:$false] %s356_s24 }
  0x24   : > { %s358_s28 = scalar_lea.vmem %s357_s24, 256  ;;  %p359_p4 = scmp.lt.s32.totalorder %s531_s8, %s357_s24 }
  0x25   : > { %p354_p1 = pnand %p352_p0, %p340_p3  ;;  %p360_p12 = scmp.lt.s32.totalorder %s358_s28, %s351_s21 }
  0x27   : > { %p355_p2 = pneg %p354_p1  ;;  %p361_p11 = por %p360_p12, %p359_p4 }
  0x29   : > { %p362_p6 = pnand %p361_p11, %p355_p2 }
  0x2b   : > { %365 = shalt.err (!%p362_p6)
}
  0x2c   : > { %299 = dma.hbm_to_vmem [thread:$0]  (!%p527_p13), %s523_s6, 128, %s531_s8, %s140_s10  }
  0x2d   : > { %p612_p9 = scmp.lt.s32.totalorder %s430_s19, 3  ;;  %p613_p7 = scmp.ge.s32.totalorder %s430_s19, 1 }
  0x2f   : > { %p156_p0 = pnand %p613_p7, %p612_p9 }
  0x30   : > { %s558_s29 = sand.u32 (!%p156_p0), 1, %s422_s17   ;;  %p614_p6 = scmp.ne.s32.totalorder (!%p156_p0), %s608_s25, 0 }
  0x31   : > { %159 = sbr.rel (%p156_p0) target bundleno = 81 (0x51), region = 32  ;;  %s286_s30 = sshll.u32 (!%p156_p0), %s558_s29, 3 }
  0x32   : > { %s162_s4 = scalar_lea.sflag (!%p156_p0), [#allocation5], %s558_s29  ;;  %s165_s5 = scalar_lea.vmem (!%p156_p0), [#allocation4], %s286_s30 }
  0x36   : > { %409 = dma.done.wait (%p614_p6), %s162_s4, 128  }
  0x37   : > { %411 = vsyncadd (%p614_p6), %s162_s4, 4294967168  ;;  %s188_s6 = sld [smem:[#allocation2]]  ;;  %v190_v0 = vld [vmem:[%s165_s5] sm:$0xff]  ;;  %s187_s8 = scalar_lea.vmem [#allocation7], %s286_s30 }
  0x38   : > { %s189_s7 = sld [smem:[#allocation3]]  ;;  %s210_s9 = sshll.u32 %s187_s8, 4  ;;  %s211_s9 = int_to_ptr.vmem [resolvable:$true] %s210_s9 }
  0x39   : > { %s289_s10 = sshll.u32 %s481_s0, 7  ;;  %s197_s25 = scalar_lea.sflag [#allocation6], %s558_s29 }
  0x3a   : > { %s208_s13 = scalar_lea.hbm %s604_s3, %s289_s10  ;;  %s366_s14 = scalar_lea.vmem %s211_s9, 128 }
  0x3b   : > { %p367_p11 = scmp.ne.s32.totalorder %s211_s9, %s366_s14  ;;  %p615_p12 = scmp.ne.s32.totalorder %s609_s26, 0 }
  0x3c   : > { %s433_s15 = smov [#allocation7]  }
  0x3d   : > { %v191_v1 = vstv %s188_s6  ;;  %p368_p13 = pnand %p367_p11, %p615_p12  ;;  %s370_s1 = sshll.u32 %s433_s15, 4  ;;  %s371_s1 = int_to_ptr.vmem [resolvable:$false] %s370_s1 }
  0x3e   : > { %v192_v2 = vmul.f32 %v191_v1, %v190_v0  ;;  %v193_v3 = vstv %s189_s7  ;;  %s372_s21 = scalar_lea.vmem %s371_s1, 256  ;;  %p373_p3 = scmp.lt.s32.totalorder %s211_s9, %s371_s1 }
  0x3f   : > { %p369_p1 = pneg %p368_p13  ;;  %p374_p5 = scmp.lt.s32.totalorder %s372_s21, %s366_s14 }
  0x40   : > { %v194_v4 = vadd.f32 %v193_v3, %v192_v2 }
  0x41   : > { %p375_p8 = por %p374_p5, %p373_p3 }
  0x42   : > { %195 = vst [vmem:[%s187_s8] sm:$0xff] %v194_v4 }
  0x43   : > { %p376_p10 = pnand %p375_p8, %p369_p1 }
  0x45   : > { %379 = shalt.err (!%p376_p10)
}
  0x46   : > { %s380_s0 = scalar_lea.hbm %s208_s13, 128  ;;  %s384_s28 = scalar_lea.hbm %s604_s3, 256 }
  0x47   : > { %p381_p2 = scmp.ne.s32.totalorder %s208_s13, %s380_s0  ;;  %p385_p7 = scmp.lt.s32.totalorder %s208_s13, %s604_s3 }
  0x48   : > { %p386_p0 = scmp.lt.s32.totalorder %s384_s28, %s380_s0 }
  0x49   : > { %p382_p4 = pnand %p381_p2, %p615_p12 }
  0x4a   : > { %p387_p6 = por %p386_p0, %p385_p7 }
  0x4b   : > { %p383_p9 = pneg %p382_p4 }
  0x4d   : > { %p388_p11 = pnand %p387_p6, %p383_p9 }
  0x4f   : > { %391 = shalt.err (!%p388_p11)
}
  0x50   : > { %294 = dma.vmem_to_hbm [thread:$0]  (%p615_p12), %s211_s9, 128, %s208_s13, %s197_s25  }
  0x51 PF: > { %s222_s4 = sand.u32 1, %s418_s16   ;;  %p616_p13 = scmp.ne.s32.totalorder %s610_s27, 0 }
  0x52   : > { %p617_p1 = scmp.ge.s32.totalorder %s430_s19, 2  ;;  %s223_s5 = scalar_lea.sflag [#allocation6], %s222_s4 }
  0x54   : > { %p301_p3 = pnand %p617_p1, %p616_p13 }
  0x56   : > { %p302_p5 = pneg %p301_p3 }
  0x58   : > { %413 = dma.done.wait (%p302_p5), %s223_s5, 128  }
  0x59   : > { %415 = vsyncadd (%p302_p5), %s223_s5, 4294967168  ;;  %p18_p8 = scmp.ge.s32.totalorder %s485_s20, 4   ;;  %s618_s16 = smov %s422_s17 }
  0x5a   : > { %s619_s17 = smov %s426_s18  ;;  %s620_s18 = smov %s497_s23 }
  0x5b   : > { %s621_s19 = smov %s485_s20  ;;  %20 = sbr.rel (!%p18_p8) target bundleno = 8 (0x8), region = 77 }
  0x60   :  { %228 = vsyncpa [#allocation5], 1 }
  0x61   :  { %230 = vsyncpa [#allocation5 + $0x1], 1 }
  0x62   :  { %231 = vsyncpa [#allocation6], 1 }
  0x63   :  { %233 = vsyncpa [#allocation6 + $0x1], 1 }

</bundles_post_ra>
